<compile_context>
chip_gen: v5e
topology: v5e:2x2
jax: 0.10.0
libtpu: 0.0.40
codegen_flags: <defaults>
</compile_context>

<pallas_src>
import functools
import numpy as np
import jax
import jax.numpy as jnp
from jax.experimental import pallas as pl
from jax.experimental.pallas import tpu as pltpu

LANES = 128
P_ROWS = 80          # packed parameter slab rows (8-aligned)
# slab layout (rows x cols):
#   [ 0: 3, 0: 32]  conv1 as zero-padded block-Toeplitz (3, 32)
#   [ 8:40, 0: 32]  conv2 taps stacked (32, 32)
#   [40:72, 0:128]  fc weight transposed (32, 128)
#   [72   , 0: 32]  conv1 bias duplicated over the 2 timesteps
#   [73   , 0: 32]  conv2 bias
#   [74   , 0:128]  fc bias
MAX_BATCH_TILE = 512


def _round_up(n, m):
    return ((n + m - 1) // m) * m


# ----------------------------------------------------------------------------
# Fused kernel: conv1(k=2)+ReLU -> conv2(k=2)+ReLU -> Linear(32,128)+ReLU
# expressed as three MXU matmuls on a batch tile.
# ----------------------------------------------------------------------------
def _fused_kernel(x_ref, p_ref, out_ref):
    x = x_ref[...]                                   # (TB, 3)

    w1 = p_ref[0:3, 0:32]                            # (3, 32)  conv1 Toeplitz
    w2 = p_ref[8:40, 0:32]                           # (32, 32) conv2 stacked taps
    wfc = p_ref[40:72, :]                            # (32, 128) fc^T
    b1 = p_ref[72:73, 0:32]                          # (1, 32)
    b2 = p_ref[73:74, 0:32]                          # (1, 32)
    bfc = p_ref[74:75, :]                            # (1, 128)

    # conv1: h1[:, 0:16] = output @ t=0, h1[:, 16:32] = output @ t=1
    h1 = jnp.maximum(
        jnp.dot(x, w1, preferred_element_type=jnp.float32) + b1, 0.0)
    # conv2 (contract over 16 channels x 2 taps = 32)
    h2 = jnp.maximum(
        jnp.dot(h1, w2, preferred_element_type=jnp.float32) + b2, 0.0)
    # classifier (lane-dense 128-wide store)
    out_ref[...] = jnp.maximum(
        jnp.dot(h2, wfc, preferred_element_type=jnp.float32) + bfc, 0.0)


# ----------------------------------------------------------------------------
# One-time host-side packing of PyTorch-shaped params into a single slab.
# ----------------------------------------------------------------------------
def pack_params(p):
    conv1_w = np.asarray(p["conv1_w"], np.float32)   # (16, 1, 2)
    conv1_b = np.asarray(p["conv1_b"], np.float32)   # (16,)
    conv2_w = np.asarray(p["conv2_w"], np.float32)   # (32, 16, 2)
    conv2_b = np.asarray(p["conv2_b"], np.float32)   # (32,)
    fc_w = np.asarray(p["fc_w"], np.float32)         # (128, 32)
    fc_b = np.asarray(p["fc_b"], np.float32)         # (128,)

    slab = np.zeros((P_ROWS, LANES), np.float32)

    w1t = conv1_w[:, 0, :].T                         # (2, 16), w1t[k, oc]
    slab[0:2, 0:16] = w1t                            # timestep 0 taps
    slab[1:3, 16:32] = w1t                           # timestep 1 taps

    slab[8:24, 0:32] = conv2_w[:, :, 0].T            # tap k=0: (16, 32)
    slab[24:40, 0:32] = conv2_w[:, :, 1].T           # tap k=1: (16, 32)

    slab[40:72, :] = fc_w.T                          # (32, 128)

    slab[72, 0:16] = conv1_b
    slab[72, 16:32] = conv1_b
    slab[73, 0:32] = conv2_b
    slab[74, :] = fc_b
    return jnp.asarray(slab)


# ----------------------------------------------------------------------------
# Jitted forward: pad batch to 8-aligned tile, 1-D batch grid, slice back.
# ----------------------------------------------------------------------------
@jax.jit
def simple1dcnn_forward(x, param_slab):
    """x: (B, 3) float32 -> (B, 128) float32, matching Simple1DCNN.forward."""
    B, L = x.shape
    assert L == 3, "Linear(32, 128) after two valid k=2 convs requires seq len 3"

    tb = min(MAX_BATCH_TILE, _round_up(B, 8))        # 8-aligned batch tile
    b_pad = _round_up(B, tb)
    x_p = jnp.pad(x, ((0, b_pad - B), (0, 0))) if b_pad != B else x
    grid = (b_pad // tb,)

    flops = 2 * b_pad * (3 * 32 + 32 * 32 + 32 * 128)
    bytes_accessed = 4 * (b_pad * 3 + P_ROWS * LANES + b_pad * 128)

    out = pl.pallas_call(
        _fused_kernel,
        out_shape=jax.ShapeDtypeStruct((b_pad, 128), jnp.float32),
        grid=grid,
        in_specs=[
            pl.BlockSpec((tb, 3), lambda i: (i, 0)),
            pl.BlockSpec((P_ROWS, LANES), lambda i: (0, 0)),  # VMEM-resident
        ],
        out_specs=pl.BlockSpec((tb, LANES), lambda i: (i, 0)),
        compiler_params=pltpu.CompilerParams(
            dimension_semantics=("parallel",)),
        cost_estimate=pl.CostEstimate(
            flops=flops, transcendentals=0, bytes_accessed=bytes_accessed),
    )(x_p, param_slab)
    return out[:B]


# ----------------------------------------------------------------------------
# Deterministic parameter init (PyTorch-like uniform(-1/sqrt(fan_in), +)).
# Weights kept in native PyTorch shapes; packed once via pack_params.
# ----------------------------------------------------------------------------
def init_params(key):
    def uniform(k, shape, fan_in):
        bound = 1.0 / np.sqrt(fan_in)
        return jax.random.uniform(k, shape, jnp.float32, -bound, bound)

    ks = jax.random.split(key, 6)
    return {
        "conv1_w": uniform(ks[0], (16, 1, 2), 1 * 2),
        "conv1_b": uniform(ks[1], (16,), 1 * 2),
        "conv2_w": uniform(ks[2], (32, 16, 2), 16 * 2),
        "conv2_b": uniform(ks[3], (32,), 16 * 2),
        "fc_w": uniform(ks[4], (128, 32), 32),       # torch Linear: (out, in)
        "fc_b": uniform(ks[5], (128,), 32),
    }


# ----------------------------------------------------------------------------
# Pure-JAX reference (same math as the PyTorch module) for a sanity check.
# ----------------------------------------------------------------------------
def reference_forward(x, p):
    xt = x[:, None, :]                               # (B, 1, 3)
    w1, b1 = p["conv1_w"], p["conv1_b"]              # (16,1,2), (16,)
    h1 = jnp.stack(
        [jnp.einsum("bci,oci->bo", xt[:, :, t:t + 2], w1) for t in range(2)],
        axis=-1) + b1[None, :, None]                 # (B, 16, 2)
    h1 = jax.nn.relu(h1)
    w2, b2 = p["conv2_w"], p["conv2_b"]              # (32,16,2), (32,)
    h2 = jax.nn.relu(jnp.einsum("bci,oci->bo", h1, w2) + b2)   # (B, 32)
    return jax.nn.relu(h2 @ p["fc_w"].T + p["fc_b"])           # (B, 128)


if __name__ == "__main__":
    key = jax.random.PRNGKey(0)
    pkey, xkey = jax.random.split(key)
    params = init_params(pkey)
    param_slab = pack_params(params)                 # one-time re-layout

    # Linear(32, 128) implies sequence length 3 (two valid k=2 convs -> length 1).
    x = jax.random.normal(xkey, (2, 3), jnp.float32)

    out = simple1dcnn_forward(x, param_slab)
    out = jax.block_until_ready(out)
    assert out.shape == (2, 128) and out.dtype == jnp.float32

    ref = reference_forward(x, params)
    np.testing.assert_allclose(np.asarray(out), np.asarray(ref),
                               rtol=1e-4, atol=1e-4)

    print("KERNEL_OK")
</pallas_src>

<mosaic_0001>
module attributes {stable_mosaic.version = 11 : i64} {
  func.func @_fused_kernel(%arg0: i32, %arg1: memref<8x3xf32, #tpu.memory_space<vmem>>, %arg2: memref<80x128xf32, #tpu.memory_space<vmem>>, %arg3: memref<8x128xf32, #tpu.memory_space<vmem>>) attributes {dimension_semantics = [#tpu.dimension_semantics<parallel>], iteration_bounds = array<i64: 1>, scalar_prefetch = 0 : i64, scratch_operands = 0 : i64, tpu.core_type = #tpu.core_type<tc>, window_params = [{transform_indices = @transform_0, window_bounds = array<i64: 8, 3>}, {pipeline_mode = #tpu.pipeline_mode<synchronous>, transform_indices = @transform_1, window_bounds = array<i64: 80, 128>}, {transform_indices = @transform_2, window_bounds = array<i64: 8, 128>}]} {
    %c0 = arith.constant 0 : index
    %c0_0 = arith.constant 0 : index
    %0 = vector.load %arg1[%c0, %c0_0] : memref<8x3xf32, #tpu.memory_space<vmem>>, vector<8x3xf32>
    %c0_1 = arith.constant 0 : index
    %c0_2 = arith.constant 0 : index
    %1 = vector.load %arg2[%c0_1, %c0_2] : memref<80x128xf32, #tpu.memory_space<vmem>>, vector<3x32xf32>
    %c8 = arith.constant 8 : index
    %c0_3 = arith.constant 0 : index
    %2 = vector.load %arg2[%c8, %c0_3] : memref<80x128xf32, #tpu.memory_space<vmem>>, vector<32x32xf32>
    %c40 = arith.constant 40 : index
    %c0_4 = arith.constant 0 : index
    %3 = vector.load %arg2[%c40, %c0_4] : memref<80x128xf32, #tpu.memory_space<vmem>>, vector<32x128xf32>
    %c72 = arith.constant 72 : index
    %c0_5 = arith.constant 0 : index
    %4 = vector.load %arg2[%c72, %c0_5] : memref<80x128xf32, #tpu.memory_space<vmem>>, vector<1x32xf32>
    %c73 = arith.constant 73 : index
    %c0_6 = arith.constant 0 : index
    %5 = vector.load %arg2[%c73, %c0_6] : memref<80x128xf32, #tpu.memory_space<vmem>>, vector<1x32xf32>
    %c74 = arith.constant 74 : index
    %c0_7 = arith.constant 0 : index
    %6 = vector.load %arg2[%c74, %c0_7] : memref<80x128xf32, #tpu.memory_space<vmem>>, vector<1x128xf32>
    %cst = arith.constant dense<0.000000e+00> : vector<8x32xf32>
    %7 = tpu.matmul %0, %1, %cst {dimension_numbers = #tpu.dot_dimension_numbers<[1], [0], [0], [1], [0, 0, 1, 1], [], []>} : vector<8x3xf32>, vector<3x32xf32>, vector<8x32xf32> -> vector<8x32xf32>
    %8 = vector.broadcast %4 : vector<1x32xf32> to vector<8x32xf32>
    %9 = arith.addf %7, %8 : vector<8x32xf32>
    %cst_8 = arith.constant 0.000000e+00 : f32
    %10 = vector.broadcast %cst_8 : f32 to vector<8x32xf32>
    %11 = arith.maximumf %9, %10 : vector<8x32xf32>
    %cst_9 = arith.constant dense<0.000000e+00> : vector<8x32xf32>
    %12 = tpu.matmul %11, %2, %cst_9 {dimension_numbers = #tpu.dot_dimension_numbers<[1], [0], [0], [1], [0, 0, 1, 1], [], []>} : vector<8x32xf32>, vector<32x32xf32>, vector<8x32xf32> -> vector<8x32xf32>
    %13 = vector.broadcast %5 : vector<1x32xf32> to vector<8x32xf32>
    %14 = arith.addf %12, %13 : vector<8x32xf32>
    %cst_10 = arith.constant 0.000000e+00 : f32
    %15 = vector.broadcast %cst_10 : f32 to vector<8x32xf32>
    %16 = arith.maximumf %14, %15 : vector<8x32xf32>
    %cst_11 = arith.constant dense<0.000000e+00> : vector<8x128xf32>
    %17 = tpu.matmul %16, %3, %cst_11 {dimension_numbers = #tpu.dot_dimension_numbers<[1], [0], [0], [1], [0, 0, 1, 1], [], []>} : vector<8x32xf32>, vector<32x128xf32>, vector<8x128xf32> -> vector<8x128xf32>
    %18 = vector.broadcast %6 : vector<1x128xf32> to vector<8x128xf32>
    %19 = arith.addf %17, %18 : vector<8x128xf32>
    %cst_12 = arith.constant 0.000000e+00 : f32
    %20 = vector.broadcast %cst_12 : f32 to vector<8x128xf32>
    %21 = arith.maximumf %19, %20 : vector<8x128xf32>
    %c0_13 = arith.constant 0 : index
    %c0_14 = arith.constant 0 : index
    %22 = vector.load %arg3[%c0_13, %c0_14] : memref<8x128xf32, #tpu.memory_space<vmem>>, vector<8x128xf32>
    tpu.vector_store %arg3[%c0_13, %c0_14], %21 {strides = array<i32>} : memref<8x128xf32, #tpu.memory_space<vmem>>, vector<8x128xf32>,
    return
  }
  func.func @transform_0(%arg0: i32) -> (i32, i32) {
    %c0_i32 = arith.constant 0 : i32
    %c0_i32_0 = arith.constant 0 : i32
    return %arg0, %c0_i32 : i32, i32
  }
  func.func @transform_1(%arg0: i32) -> (i32, i32) {
    %c0_i32 = arith.constant 0 : i32
    %c0_i32_0 = arith.constant 0 : i32
    %c0_i32_1 = arith.constant 0 : i32
    return %c0_i32, %c0_i32_0 : i32, i32
  }
  func.func @transform_2(%arg0: i32) -> (i32, i32) {
    %c0_i32 = arith.constant 0 : i32
    %c0_i32_0 = arith.constant 0 : i32
    return %arg0, %c0_i32 : i32, i32
  }
}

</mosaic_0001>

<bundles_post_ra>
// kernel: simple1dcnn_forward.1
= control target key start
LH: loop header
LB: loop body
LE: loop exit
PB: predicated region body
PF: predicated region fallthrough
CT: control target
= control target key end

     0   :  { %7 = vsyncpa [#allocation3], 0  ;;  %s163_s12 = smov [#allocation2]   ;;  %s164_s14 = smov 128   ;;  %s190_s0 = inlined_call_operand.vmem [shape: f32[8,3], index: 0, kind: input, shape index: {}]   ;;  %s191_s1 = inlined_call_operand.hbm [shape: f32[80,128], index: 1, kind: input, shape index: {}]   ;;  %s192_s2 = inlined_call_operand.vmem [shape: f32[8,128], index: 2, kind: output, shape index: {}]  }
   0x1   :  { %s14_s11 = sshll.u32 %s191_s1, 4  ;;  %s16_s13 = sshll.u32 %s163_s12, 4  ;;  %s15_s11 = int_to_ptr.hbm [resolvable:$true] %s14_s11  ;;  %s17_s13 = int_to_ptr.vmem [resolvable:$true] %s16_s13 }
   0x2   :  { %s165_s15 = smov 8  }
   0x3   :  { %22 = dma.hbm_to_vmem [thread:$0]  %s15_s11, 1280, %s17_s13, [#allocation3], %s164_s14, %s164_s14, %s165_s15  }
   0x4   :  { %161 = dma.done.wait [#allocation3], 1280  }
   0x5   :  { %162 = vsyncadd [#allocation3], 4294966016  ;;  %vm45_vm0 = vcmask 1042432   ;;  %vm41_vm1 = vcmask 23552   ;;  %v28_v0 = vld [vmem:[#allocation2] sm:$0x7] }
   0x6   :  { %v27_v1 = vld [vmem:[%s190_s0] sm:$0xff]  ;;  %127 = vmatpush.msk.msra.mxu0 %vm45_vm0, %v28_v0  ;;  %v31_v3 = vld [vmem:[#allocation2 + $0x18] sm:$0xff]  ;;  %v30_v4 = vld [vmem:[#allocation2 + $0x10] sm:$0xff]  ;;  %vm71_vm2 = vcmask 261120  }
   0x7   :  { %v32_v2 = vld [vmem:[#allocation2 + $0x20] sm:$0xff]  ;;  %128 = vmatmul.msk.f32.vlgmr.msra.gmra.mxu0 %vm41_vm1, %v27_v1  ;;  %v29_v5 = vld [vmem:[#allocation2 + $0x8] sm:$0xff]  ;;  %v35_v11 = vld [vmem:[#allocation2 + $0x38] sm:$0xff] }
   0x8   :  { %87 = vmatpush.msra.mxu1 %v32_v2  ;;  %v36_v6 = vld [vmem:[#allocation2 + $0x40] sm:$0xff]  ;;  %v134_v7 = vld [vmem:[#allocation2 + $0x48] ss:$0 sm:$0xff]  ;;  %v34_v12 = vld [vmem:[#allocation2 + $0x30] sm:$0xff] }
   0x9   :  { %112 = vmatpush.msra.mxu2 %v36_v6  ;;  %v33_v13 = vld [vmem:[#allocation2 + $0x28] sm:$0xff] }
   0xa   :  { %88 = vmatpush.msra.mxu1 %v31_v3  ;;  %v135_v14 = vld [vmem:[#allocation2 + $0x49] ss:$0 sm:$0xff]  ;;  %v136_v18 = vld [vmem:[#allocation2 + $0x4a] ss:$0 sm:$0xff] }
   0xb   :  { %113 = vmatpush.msra.mxu2 %v35_v11 }
   0xc   :  { %89 = vmatpush.msra.mxu1 %v30_v4 }
   0xd   :  { %114 = vmatpush.msra.mxu2 %v34_v12 }
   0xe   :  { %90 = vmatpush.msra.mxu1 %v29_v5 }
   0xf   :  { %115 = vmatpush.msra.mxu2 %v33_v13 }
  0x84   :  { %v66_v8 = vpop.f32.mrf.mxu0 }
  0x85   :  { %v67_v9 = vadd.f32 %v134_v7, %v66_v8 }
  0x87   :  { %v69_v10 = vmax.f32 %v67_v9, 0.0 }
  0x89   :  { %129 = vmatmul.msk.f32.vlgmr.msra.gmra.mxu1 %vm71_vm2, %v69_v10 }
 0x106   :  { %v92_v15 = vpop.f32.mrf.mxu1 }
 0x107   :  { %v93_v16 = vadd.f32 %v135_v14, %v92_v15 }
 0x109   :  { %v95_v17 = vmax.f32 %v93_v16, 0.0 }
 0x10b   :  { %130 = vmatmul.msk.f32.vlgmr.msra.gmra.mxu2 %vm71_vm2, %v95_v17 }
 0x18e   :  { %v117_v19 = vpop.f32.mrf.mxu2 }
 0x18f   :  { %v118_v20 = vadd.f32 %v136_v18, %v117_v19 }
 0x191   :  { %v120_v21 = vmax.f32 %v118_v20, 0.0 }
 0x193   :  { %121 = vst [vmem:[%s192_s2] sm:$0xff] %v120_v21 }
 0x194   :  { %126 = vsyncpa [#allocation3], 1 }

</bundles_post_ra>
